<compile_context>
chip_gen: v6e
topology: v6e:2x2x1
jax: 0.10.0
libtpu: 0.0.40
codegen_flags: <defaults>
</compile_context>

<pallas_src>
import jax
import jax.numpy as jnp
from jax.experimental import pallas as pl
from jax.experimental.pallas import tpu as pltpu

L1_SIZE = 10
L2_SIZE = 10
LEAKY_SLOPE = 0.01   # PyTorch F.leaky_relu default negative_slope
LANE = 128           # TPU lane width: pad output features to this for dense stores
MAX_TM = 1024        # batch-tile cap (VMEM-safe on v5e/v6e/v7x)


def _leaky_relu(x):
    return jnp.where(x > 0, x, LEAKY_SLOPE * x)


def actor_kernel(x_ref, w1_ref, b1_ref, w2_ref, b2_ref, w3_ref, b3_ref, o_ref):
    x = x_ref[...]
    h1 = _leaky_relu(
        jnp.dot(x, w1_ref[...], preferred_element_type=jnp.float32) + b1_ref[...])
    h2 = _leaky_relu(
        jnp.dot(h1, w2_ref[...], preferred_element_type=jnp.float32) + b2_ref[...])
    h3 = jnp.dot(h2, w3_ref[...], preferred_element_type=jnp.float32) + b3_ref[...]
    o_ref[...] = jnp.tanh(h3).astype(o_ref.dtype)


def actor_forward(state, params, *, block_batch=MAX_TM):
    """Fused forward pass of the Actor MLP as one Pallas kernel.

    state: (B, state_size) float32
    params: dict with w1 (S, L1), b1 (1, L1), w2 (L1, L2), b2 (1, L2),
            w3 (L2, A), b3 (1, A)
    returns: (B, action_size) float32
    """
    w1, b1 = params["w1"], params["b1"]
    w2, b2 = params["w2"], params["b2"]
    w3, b3 = params["w3"], params["b3"]

    B, S = state.shape
    A = w3.shape[1]

    # ---- lane-dense output: zero-pad last layer to a full 128-lane width ----
    A_pad = ((A + LANE - 1) // LANE) * LANE
    w3p = jnp.zeros((L2_SIZE, A_pad), jnp.float32).at[:, :A].set(w3)
    b3p = jnp.zeros((1, A_pad), jnp.float32).at[:, :A].set(b3)

    # ---- batch tile: multiple of 8 (f32 sublane), capped at block_batch ----
    tm = min(block_batch, ((B + 7) // 8) * 8)
    tm = max(8, ((tm + 7) // 8) * 8)
    B_pad = ((B + tm - 1) // tm) * tm
    if B_pad != B:
        state_in = jnp.zeros((B_pad, S), state.dtype).at[:B].set(state)
    else:
        state_in = state

    grid = (B_pad // tm,)

    cost = pl.CostEstimate(
        flops=2 * B_pad * (S * L1_SIZE + L1_SIZE * L2_SIZE + L2_SIZE * A_pad),
        transcendentals=B_pad * A_pad,  # tanh
        bytes_accessed=4 * (B_pad * S + B_pad * A_pad
                            + S * L1_SIZE + L1_SIZE
                            + L1_SIZE * L2_SIZE + L2_SIZE
                            + L2_SIZE * A_pad + A_pad),
    )

    # Weights/biases: full-array blocks with constant index_map -> DMA'd once,
    # kept resident in VMEM across all batch tiles.
    resident = lambda arr: pl.BlockSpec(arr.shape, lambda i: (0, 0))

    out_pad = pl.pallas_call(
        actor_kernel,
        out_shape=jax.ShapeDtypeStruct((B_pad, A_pad), jnp.float32),
        grid=grid,
        in_specs=[
            pl.BlockSpec((tm, S), lambda i: (i, 0)),   # state: tiled over batch
            resident(w1), resident(b1),
            resident(w2), resident(b2),
            resident(w3p), resident(b3p),
        ],
        out_specs=pl.BlockSpec((tm, A_pad), lambda i: (i, 0)),
        compiler_params=pltpu.CompilerParams(
            dimension_semantics=("parallel",)),       # 2x on v7x dual-TC
        cost_estimate=cost,
    )(state_in, w1, b1, w2, b2, w3p, b3p)

    return out_pad[:B, :A]


def init_actor_params(key, state_size, action_size):
    """Deterministic synthetic init matching the PyTorch module's shapes.

    Weights ~ U(-0.003, 0.003) (per reset_parameters); biases use the PyTorch
    nn.Linear default U(-1/sqrt(fan_in), 1/sqrt(fan_in)).
    """
    k = jax.random.split(key, 6)
    u = lambda kk, shape, lim: jax.random.uniform(
        kk, shape, minval=-lim, maxval=lim, dtype=jnp.float32)
    return {
        "w1": u(k[0], (state_size, L1_SIZE), 0.003),
        "b1": u(k[1], (1, L1_SIZE), 1.0 / (state_size ** 0.5)),
        "w2": u(k[2], (L1_SIZE, L2_SIZE), 0.003),
        "b2": u(k[3], (1, L2_SIZE), 1.0 / (L1_SIZE ** 0.5)),
        "w3": u(k[4], (L2_SIZE, action_size), 0.003),
        "b3": u(k[5], (1, action_size), 1.0 / (L2_SIZE ** 0.5)),
    }


def actor_forward_ref(state, params):
    """Pure-JAX reference for verification."""
    h = state @ params["w1"] + params["b1"]
    h = jnp.where(h > 0, h, LEAKY_SLOPE * h)
    h = h @ params["w2"] + params["b2"]
    h = jnp.where(h > 0, h, LEAKY_SLOPE * h)
    h = h @ params["w3"] + params["b3"]
    return jnp.tanh(h)


if __name__ == "__main__":
    key = jax.random.PRNGKey(0)
    k_param, k_state = jax.random.split(key)

    batch = 8
    state_size = 16
    action_size = 4

    params = init_actor_params(k_param, state_size, action_size)
    state = jax.random.normal(k_state, (batch, state_size), dtype=jnp.float32)

    out = actor_forward(state, params)
    out = jax.block_until_ready(out)

    ref = actor_forward_ref(state, params)
    assert out.shape == (batch, action_size)
    assert jnp.allclose(out, ref, atol=1e-5, rtol=1e-5)

    # Also exercise a multi-tile batch (ragged, forces padding + grid>1).
    big_state = jax.random.normal(k_state, (2000, state_size), dtype=jnp.float32)
    big_out = jax.block_until_ready(actor_forward(big_state, params))
    big_ref = actor_forward_ref(big_state, params)
    assert big_out.shape == (2000, action_size)
    assert jnp.allclose(big_out, big_ref, atol=1e-5, rtol=1e-5)

    print("KERNEL_OK")
</pallas_src>

<mosaic_0001>
module attributes {stable_mosaic.version = 11 : i64} {
  func.func @actor_kernel(%arg0: i32, %arg1: memref<8x16xf32, #tpu.memory_space<vmem>>, %arg2: memref<16x10xf32, #tpu.memory_space<vmem>>, %arg3: memref<1x10xf32, #tpu.memory_space<vmem>>, %arg4: memref<10x10xf32, #tpu.memory_space<vmem>>, %arg5: memref<1x10xf32, #tpu.memory_space<vmem>>, %arg6: memref<10x128xf32, #tpu.memory_space<vmem>>, %arg7: memref<1x128xf32, #tpu.memory_space<vmem>>, %arg8: memref<8x128xf32, #tpu.memory_space<vmem>>) attributes {dimension_semantics = [#tpu.dimension_semantics<parallel>], iteration_bounds = array<i64: 1>, scalar_prefetch = 0 : i64, scratch_operands = 0 : i64, tpu.core_type = #tpu.core_type<tc>, window_params = [{transform_indices = @transform_0, window_bounds = array<i64: 8, 16>}, {pipeline_mode = #tpu.pipeline_mode<synchronous>, transform_indices = @transform_1, window_bounds = array<i64: 16, 10>}, {pipeline_mode = #tpu.pipeline_mode<synchronous>, transform_indices = @transform_2, window_bounds = array<i64: 1, 10>}, {pipeline_mode = #tpu.pipeline_mode<synchronous>, transform_indices = @transform_3, window_bounds = array<i64: 10, 10>}, {pipeline_mode = #tpu.pipeline_mode<synchronous>, transform_indices = @transform_4, window_bounds = array<i64: 1, 10>}, {pipeline_mode = #tpu.pipeline_mode<synchronous>, transform_indices = @transform_5, window_bounds = array<i64: 10, 128>}, {pipeline_mode = #tpu.pipeline_mode<synchronous>, transform_indices = @transform_6, window_bounds = array<i64: 1, 128>}, {transform_indices = @transform_7, window_bounds = array<i64: 8, 128>}]} {
    %c0 = arith.constant 0 : index
    %c0_0 = arith.constant 0 : index
    %0 = vector.load %arg1[%c0, %c0_0] : memref<8x16xf32, #tpu.memory_space<vmem>>, vector<8x16xf32>
    %c0_1 = arith.constant 0 : index
    %c0_2 = arith.constant 0 : index
    %1 = vector.load %arg2[%c0_1, %c0_2] : memref<16x10xf32, #tpu.memory_space<vmem>>, vector<16x10xf32>
    %cst = arith.constant dense<0.000000e+00> : vector<8x10xf32>
    %2 = tpu.matmul %0, %1, %cst {dimension_numbers = #tpu.dot_dimension_numbers<[1], [0], [0], [1], [0, 0, 1, 1], [], []>} : vector<8x16xf32>, vector<16x10xf32>, vector<8x10xf32> -> vector<8x10xf32>
    %c0_3 = arith.constant 0 : index
    %c0_4 = arith.constant 0 : index
    %3 = vector.load %arg3[%c0_3, %c0_4] : memref<1x10xf32, #tpu.memory_space<vmem>>, vector<1x10xf32>
    %4 = vector.broadcast %3 : vector<1x10xf32> to vector<8x10xf32>
    %5 = arith.addf %2, %4 : vector<8x10xf32>
    %cst_5 = arith.constant 0.000000e+00 : f32
    %6 = vector.broadcast %cst_5 : f32 to vector<8x10xf32>
    %7 = arith.cmpf ogt, %5, %6 : vector<8x10xf32>
    %cst_6 = arith.constant 0.00999999977 : f32
    %8 = vector.broadcast %cst_6 : f32 to vector<8x10xf32>
    %9 = arith.mulf %8, %5 : vector<8x10xf32>
    %10 = arith.select %7, %5, %9 : vector<8x10xi1>, vector<8x10xf32>
    %c0_7 = arith.constant 0 : index
    %c0_8 = arith.constant 0 : index
    %11 = vector.load %arg4[%c0_7, %c0_8] : memref<10x10xf32, #tpu.memory_space<vmem>>, vector<10x10xf32>
    %cst_9 = arith.constant dense<0.000000e+00> : vector<8x10xf32>
    %12 = tpu.matmul %10, %11, %cst_9 {dimension_numbers = #tpu.dot_dimension_numbers<[1], [0], [0], [1], [0, 0, 1, 1], [], []>} : vector<8x10xf32>, vector<10x10xf32>, vector<8x10xf32> -> vector<8x10xf32>
    %c0_10 = arith.constant 0 : index
    %c0_11 = arith.constant 0 : index
    %13 = vector.load %arg5[%c0_10, %c0_11] : memref<1x10xf32, #tpu.memory_space<vmem>>, vector<1x10xf32>
    %14 = vector.broadcast %13 : vector<1x10xf32> to vector<8x10xf32>
    %15 = arith.addf %12, %14 : vector<8x10xf32>
    %cst_12 = arith.constant 0.000000e+00 : f32
    %16 = vector.broadcast %cst_12 : f32 to vector<8x10xf32>
    %17 = arith.cmpf ogt, %15, %16 : vector<8x10xf32>
    %cst_13 = arith.constant 0.00999999977 : f32
    %18 = vector.broadcast %cst_13 : f32 to vector<8x10xf32>
    %19 = arith.mulf %18, %15 : vector<8x10xf32>
    %20 = arith.select %17, %15, %19 : vector<8x10xi1>, vector<8x10xf32>
    %c0_14 = arith.constant 0 : index
    %c0_15 = arith.constant 0 : index
    %21 = vector.load %arg6[%c0_14, %c0_15] : memref<10x128xf32, #tpu.memory_space<vmem>>, vector<10x128xf32>
    %cst_16 = arith.constant dense<0.000000e+00> : vector<8x128xf32>
    %22 = tpu.matmul %20, %21, %cst_16 {dimension_numbers = #tpu.dot_dimension_numbers<[1], [0], [0], [1], [0, 0, 1, 1], [], []>} : vector<8x10xf32>, vector<10x128xf32>, vector<8x128xf32> -> vector<8x128xf32>
    %c0_17 = arith.constant 0 : index
    %c0_18 = arith.constant 0 : index
    %23 = vector.load %arg7[%c0_17, %c0_18] : memref<1x128xf32, #tpu.memory_space<vmem>>, vector<1x128xf32>
    %24 = vector.broadcast %23 : vector<1x128xf32> to vector<8x128xf32>
    %25 = arith.addf %22, %24 : vector<8x128xf32>
    %26 = math.tanh %25 : vector<8x128xf32>
    %c0_19 = arith.constant 0 : index
    %c0_20 = arith.constant 0 : index
    %27 = vector.load %arg8[%c0_19, %c0_20] : memref<8x128xf32, #tpu.memory_space<vmem>>, vector<8x128xf32>
    tpu.vector_store %arg8[%c0_19, %c0_20], %26 {strides = array<i32>} : memref<8x128xf32, #tpu.memory_space<vmem>>, vector<8x128xf32>,
    return
  }
  func.func @transform_0(%arg0: i32) -> (i32, i32) {
    %c0_i32 = arith.constant 0 : i32
    %c0_i32_0 = arith.constant 0 : i32
    return %arg0, %c0_i32 : i32, i32
  }
  func.func @transform_1(%arg0: i32) -> (i32, i32) {
    %c0_i32 = arith.constant 0 : i32
    %c0_i32_0 = arith.constant 0 : i32
    %c0_i32_1 = arith.constant 0 : i32
    return %c0_i32, %c0_i32_0 : i32, i32
  }
  func.func @transform_2(%arg0: i32) -> (i32, i32) {
    %c0_i32 = arith.constant 0 : i32
    %c0_i32_0 = arith.constant 0 : i32
    %c0_i32_1 = arith.constant 0 : i32
    return %c0_i32, %c0_i32_0 : i32, i32
  }
  func.func @transform_3(%arg0: i32) -> (i32, i32) {
    %c0_i32 = arith.constant 0 : i32
    %c0_i32_0 = arith.constant 0 : i32
    %c0_i32_1 = arith.constant 0 : i32
    return %c0_i32, %c0_i32_0 : i32, i32
  }
  func.func @transform_4(%arg0: i32) -> (i32, i32) {
    %c0_i32 = arith.constant 0 : i32
    %c0_i32_0 = arith.constant 0 : i32
    %c0_i32_1 = arith.constant 0 : i32
    return %c0_i32, %c0_i32_0 : i32, i32
  }
  func.func @transform_5(%arg0: i32) -> (i32, i32) {
    %c0_i32 = arith.constant 0 : i32
    %c0_i32_0 = arith.constant 0 : i32
    %c0_i32_1 = arith.constant 0 : i32
    return %c0_i32, %c0_i32_0 : i32, i32
  }
  func.func @transform_6(%arg0: i32) -> (i32, i32) {
    %c0_i32 = arith.constant 0 : i32
    %c0_i32_0 = arith.constant 0 : i32
    %c0_i32_1 = arith.constant 0 : i32
    return %c0_i32, %c0_i32_0 : i32, i32
  }
  func.func @transform_7(%arg0: i32) -> (i32, i32) {
    %c0_i32 = arith.constant 0 : i32
    %c0_i32_0 = arith.constant 0 : i32
    return %arg0, %c0_i32 : i32, i32
  }
}

</mosaic_0001>

<bundles_post_ra>
// kernel: tpu_custom_call.1
= control target key start
LH: loop header
LB: loop body
LE: loop exit
PB: predicated region body
PF: predicated region fallthrough
CT: control target
= control target key end

     0   :  { %12 = vsyncpa [#allocation3], 0  ;;  %s600_s0 = inlined_call_operand.hbm [shape: f32[8,16], index: 0, kind: input, shape index: {}]   ;;  %s601_s1 = inlined_call_operand.hbm [shape: f32[16,10], index: 1, kind: input, shape index: {}]   ;;  %s602_s2 = inlined_call_operand.vmem [shape: f32[1,10], index: 2, kind: input, shape index: {}]   ;;  %s603_s3 = inlined_call_operand.hbm [shape: f32[10,10], index: 3, kind: input, shape index: {}]   ;;  %s604_s4 = inlined_call_operand.vmem [shape: f32[1,10], index: 4, kind: input, shape index: {}]   ;;  %s605_s5 = inlined_call_operand.hbm [shape: f32[10,128], index: 5, kind: input, shape index: {}]   ;;  %s606_s6 = inlined_call_operand.vmem [shape: f32[1,128], index: 6, kind: input, shape index: {}]   ;;  %s607_s7 = inlined_call_operand.hbm [shape: f32[8,128], index: 7, kind: output, shape index: {}]  }
   0x1   :  { %13 = vsyncpa [#allocation6], 0 }
   0x2   :  { %14 = vsyncpa [#allocation9], 0 }
   0x3   :  { %15 = vsyncpa [#allocation4], 0  ;;  %s518_s24 = smov [#allocation5]  }
   0x4   :  { %s31_s25 = sshll.u32 %s518_s24, 4  ;;  %s32_s25 = int_to_ptr.vmem [resolvable:$true] %s31_s25 }
   0x5   :  { %s418_s26 = scalar_lea.vmem %s32_s25, 256  ;;  %p423_p1 = scmp.lt.s32.totalorder %s32_s25, %s32_s25 }
   0x6   :  { %p419_p0 = scmp.ne.s32.totalorder %s32_s25, %s418_s26  ;;  %p424_p2 = scmp.lt.s32.totalorder %s418_s26, %s418_s26 }
   0x8   :  { %p425_p3 = por %p424_p2, %p423_p1 }
   0xa   :  { %p426_p4 = pnand %p425_p3, %p419_p0 }
   0xc   :  { %429 = shalt.err (!%p426_p4)
}
   0xd   :  { %s519_s27 = smov 128   ;;  %s520_s28 = smov 8  }
   0xe   :  { %37 = dma.hbm_to_vmem [thread:$0]  %s601_s1, 256, %s32_s25, [#allocation6], %s519_s27, %s519_s27, %s520_s28  }
   0xf   :  { %s521_s8 = smov [#allocation2]   ;;  %s522_s10 = smov [#allocation7]  }
  0x10   :  { %s22_s9 = sshll.u32 %s521_s8, 4  ;;  %s45_s11 = sshll.u32 %s522_s10, 4  ;;  %s23_s9 = int_to_ptr.vmem [resolvable:$true] %s22_s9  ;;  %s46_s11 = int_to_ptr.vmem [resolvable:$true] %s45_s11 }
  0x11   :  { %s438_s12 = scalar_lea.vmem %s23_s9, 128  ;;  %p443_p6 = scmp.lt.s32.totalorder %s23_s9, %s23_s9 }
  0x12   :  { %p439_p5 = scmp.ne.s32.totalorder %s23_s9, %s438_s12  ;;  %p444_p7 = scmp.lt.s32.totalorder %s438_s12, %s438_s12 }
  0x14   :  { %p445_p8 = por %p444_p7, %p443_p6 }
  0x16   :  { %p446_p9 = pnand %p445_p8, %p439_p5 }
  0x18   :  { %449 = shalt.err (!%p446_p9)
}
  0x19   :  { %25 = dma.hbm_to_vmem [thread:$0]  %s600_s0, 128, %s23_s9, [#allocation3]  }
  0x1a   :  { %s458_s15 = scalar_lea.vmem %s46_s11, 256  ;;  %p463_p11 = scmp.lt.s32.totalorder %s46_s11, %s46_s11 }
  0x1b   :  { %p459_p10 = scmp.ne.s32.totalorder %s46_s11, %s458_s15  ;;  %p464_p12 = scmp.lt.s32.totalorder %s458_s15, %s458_s15 }
  0x1d   :  { %p465_p13 = por %p464_p12, %p463_p11 }
  0x1f   :  { %p466_p0 = pnand %p465_p13, %p459_p10 }
  0x21   :  { %469 = shalt.err (!%p466_p0)
}
  0x22   :  { %51 = dma.hbm_to_vmem [thread:$0]  %s603_s3, 256, %s46_s11, [#allocation6], %s519_s27, %s519_s27, %s520_s28  }
  0x23   :  { %s523_s17 = smov [#allocation8]  }
  0x24   :  { %s59_s18 = sshll.u32 %s523_s17, 4  ;;  %s60_s18 = int_to_ptr.vmem [resolvable:$true] %s59_s18 }
  0x25   :  { %s478_s19 = scalar_lea.vmem %s60_s18, 256  ;;  %p483_p2 = scmp.lt.s32.totalorder %s60_s18, %s60_s18 }
  0x26   :  { %p479_p1 = scmp.ne.s32.totalorder %s60_s18, %s478_s19  ;;  %p484_p3 = scmp.lt.s32.totalorder %s478_s19, %s478_s19 }
  0x28   :  { %p485_p4 = por %p484_p3, %p483_p2 }
  0x2a   :  { %p486_p5 = pnand %p485_p4, %p479_p1 }
  0x2c   :  { %489 = shalt.err (!%p486_p5)
}
  0x2d   :  { %65 = dma.hbm_to_vmem [thread:$0]  %s605_s5, 256, %s60_s18, [#allocation9], %s519_s27, %s519_s27, %s520_s28  }
  0x2e   :  { %510 = dma.done.wait [#allocation3], 128  }
  0x2f   :  { %511 = vsyncadd [#allocation3], 4294967168 }
  0x30   :  { %512 = dma.done.wait [#allocation6], 512  }
  0x31   :  { %513 = vsyncadd [#allocation6], 4294966784 }
  0x32   :  { %514 = dma.done.wait [#allocation9], 256  }
  0x33   :  { %515 = vsyncadd [#allocation9], 4294967040  ;;  %v524_v0 = vmov 0.0   ;;  %vm525_vm0 = vmmov 0   ;;  %v82_v1 = vld [vmem:[#allocation5 + $0x8] sm:$0xff]  ;;  %v81_v2 = vld [vmem:[#allocation5] sm:$0xff] }
  0x34   :  { %378 = vmatprep.subr.mxu0 %v524_v0  ;;  %382 = vmatprep.mubr.msk.f32.mxu0 %vm525_vm0, %v524_v0  ;;  %v80_v3 = vld [vmem:[#allocation2] sm:$0xff]  ;;  %vm90_vm1 = vcmask 130048   ;;  %vm180_vm2 = vcmask 1041408   ;;  %v167_v5 = vld [vmem:[#allocation7] sm:$0xff]  ;;  %vm176_vm4 = vcmask 80896   ;;  %v257_v13 = vld [vmem:[#allocation8] sm:$0xff] }
  0x35   :  { %385 = vmatprep.subr.mxu1 %v524_v0  ;;  %389 = vmatprep.mubr.msk.f32.mxu1 %vm525_vm0, %v524_v0  ;;  %v168_v4 = vld [vmem:[#allocation7 + $0x8] sm:$0x3]  ;;  %v258_v12 = vld [vmem:[#allocation8 + $0x8] sm:$0x3]  ;;  %s526_s24 = smov [#allocation10]  }
  0x36   :  { %379 = vmatpush3.msra.mxu0 %v82_v1  ;;  %386 = vmatpush3.msk.msra.mxu1 %vm180_vm2, %v168_v4  ;;  %v361_v6 = vld [vmem:[%s602_s2] ss:$0 sm:$0xff]  ;;  %s350_s25 = sshll.u32 %s526_s24, 4  ;;  %s351_s25 = int_to_ptr.vmem [resolvable:$true] %s350_s25 }
  0x37   :  { %380 = vmatprep.subr.mxu0 %v524_v0  ;;  %387 = vmatprep.subr.mxu1 %v524_v0  ;;  %v363_v14 = vld [vmem:[%s604_s4] ss:$0 sm:$0xff]  ;;  %s490_s4 = scalar_lea.vmem %s351_s25, 128  ;;  %p495_p7 = scmp.lt.s32.totalorder %s351_s25, %s351_s25 }
  0x38   :  { %381 = vmatpush3.msra.mxu0 %v81_v2  ;;  %388 = vmatpush3.msra.mxu1 %v167_v5  ;;  %v366_v20 = vld [vmem:[%s606_s6] ss:$0 sm:$0xff]  ;;  %p491_p6 = scmp.ne.s32.totalorder %s351_s25, %s490_s4  ;;  %p496_p8 = scmp.lt.s32.totalorder %s490_s4, %s490_s4 }
  0x39   :  { %383 = vmatmul.mubr.msk.f32.vlgmr.msra.gmra.mxu0 %vm90_vm1, %v80_v3  ;;  %392 = vmatprep.subr.mxu0 %v524_v0 }
  0x3a   :  { %396 = vmatprep.mubr.msk.f32.mxu0 %vm525_vm0, %v524_v0  ;;  %393 = vmatpush3.msk.msra.mxu0 %vm180_vm2, %v258_v12  ;;  %p497_p9 = por %p496_p8, %p495_p7 }
  0x3b   :  { %394 = vmatprep.subr.mxu0 %v524_v0 }
  0x3c   :  { %395 = vmatpush3.msra.mxu0 %v257_v13  ;;  %p498_p10 = pnand %p497_p9, %p491_p6 }
  0xf9   :  { %v160_v7 = vpop.f32.mrf.mxu0 }
  0xfa   :  { %v161_v8 = vadd.f32 %v361_v6, %v160_v7 }
  0xfb   :  { %v384_v9 = vpop.f32.mrf.mxu0 }
  0xfc   :  { %vm164_vm3 = vcmp.gt.f32.partialorder %v161_v8, 0.0  ;;  %v165_v10 = vmul.f32 0.01, %v161_v8 }
  0xfe   :  { %v166_v11 = vsel %vm164_vm3, %v161_v8, %v165_v10 }
  0xff   :  { %390 = vmatmul.mubr.msk.f32.vlgmr.msra.gmra.mxu1 %vm176_vm4, %v166_v11 }
 0x1bf   :  { %v250_v15 = vpop.f32.mrf.mxu1 }
 0x1c0   :  { %v251_v16 = vadd.f32 %v363_v14, %v250_v15 }
 0x1c1   :  { %v391_v17 = vpop.f32.mrf.mxu1 }
 0x1c2   :  { %vm254_vm5 = vcmp.gt.f32.partialorder %v251_v16, 0.0  ;;  %v255_v18 = vmul.f32 0.01, %v251_v16 }
 0x1c4   :  { %v256_v19 = vsel %vm254_vm5, %v251_v16, %v255_v18 }
 0x1c5   :  { %397 = vmatmul.mubr.msk.f32.vlgmr.msra.gmra.mxu0 %vm176_vm4, %v256_v19 }
 0x285   :  { %v338_v21 = vpop.f32.mrf.mxu0 }
 0x286   :  { %v339_v22 = vadd.f32 %v366_v20, %v338_v21 }
 0x287   :  { %v398_v23 = vpop.f32.mrf.mxu0 }
 0x288   :  { %408 = vtanh.f32 %v339_v22 }
 0x295   :  { %v409_v24 = vpop.eup %408 }
 0x296   :  { %343 = vst [vmem:[#allocation10] sm:$0xff] %v409_v24 }
 0x297   :  { %501 = shalt.err (!%p498_p10)
}
 0x298   :  { %353 = dma.vmem_to_hbm [thread:$0]  %s351_s25, 128, %s607_s7, [#allocation4]  }
 0x299   :  { %516 = dma.done.wait [#allocation4], 128  }
 0x29a   :  { %517 = vsyncadd [#allocation4], 4294967168 }
 0x29b   :  { %357 = vsyncpa [#allocation3], 1 }
 0x29c   :  { %358 = vsyncpa [#allocation6], 1 }
 0x29d   :  { %359 = vsyncpa [#allocation9], 1 }
 0x29e   :  { %360 = vsyncpa [#allocation4], 1 }

</bundles_post_ra>
